<compile_context>
chip_gen: v5e
topology: v5e:2x2
jax: 0.10.0
libtpu: 0.0.40
codegen_flags: <defaults>
</compile_context>

<pallas_src>
import jax
import jax.numpy as jnp
from jax.experimental import pallas as pl
from jax.experimental.pallas import tpu as pltpu

EMBED_DIM = 768
MLP_HIDDEN_DIM = [64, 32, 8]
NUM_CLASSES = 2


def _round_up(x, m):
    return ((x + m - 1) // m) * m


def mlp_kernel(xq_ref, xr_ref,
               w0_ref, b0_ref,
               w1_ref, b1_ref,
               w2_ref, b2_ref,
               w3_ref, b3_ref,
               out_ref):
    # (xq + xr)/2 @ W0  ==  xq @ (W0/2) + xr @ (W0/2): the sum happens inside the MXU
    # with f32 accumulation, so there is no (TB, 768) VPU add/cast pass and no large
    # f32 temporaries. MXU flops for layer 0 double, but the kernel is HBM-bound and
    # the MXU has >10x slack.
    acc0 = (jnp.dot(xq_ref[...], w0_ref[...], preferred_element_type=jnp.float32)
            + jnp.dot(xr_ref[...], w0_ref[...], preferred_element_type=jnp.float32))
    h0 = jnp.tanh(acc0 + b0_ref[...])
    h1 = jnp.tanh(jnp.dot(h0, w1_ref[...], preferred_element_type=jnp.float32)
                  + b1_ref[...])
    h2 = jnp.tanh(jnp.dot(h1, w2_ref[...], preferred_element_type=jnp.float32)
                  + b2_ref[...])
    out = (jnp.dot(h2, w3_ref[...], preferred_element_type=jnp.float32)
           + b3_ref[...])
    out_ref[...] = out.astype(out_ref.dtype)


def prepare_kernel_params(params):
    """Fold the /2 averaging into W0 once at param-prep time."""
    (w0, b0), (w1, b1), (w2, b2), (w3, b3) = params
    w0k = w0 * 0.5
    return (w0k, b0, w1, b1, w2, b2, w3, b3)


def bilstm_mlp_forward(xq, xr, params, *, block_batch=2048):
    """xq, xr: (B, 768) float32. params: list of 4 (W_(in,out), b_(1,out)) pairs."""
    B = xq.shape[0]
    w0k, b0, w1, b1, w2, b2, w3, b3 = prepare_kernel_params(params)

    # Batch tile: multiple of 8 (sublane). No wrapper-side pad or cast — the kernel
    # streams the inputs as-is and Pallas handles the partial trailing block
    # (padded reads, masked writes); rows >= B are never written.
    tb = min(block_batch, _round_up(B, 8))
    grid = (pl.cdiv(B, tb),)

    act_spec = pl.BlockSpec((tb, EMBED_DIM), lambda i: (i, 0))

    def resident_spec(arr):
        # Same block index every grid step -> stays VMEM-resident (no re-fetch).
        return pl.BlockSpec(arr.shape, lambda i: (0, 0))

    flops = 2 * B * (2 * EMBED_DIM * 64 + 64 * 32 + 32 * 8 + 8 * NUM_CLASSES)
    transcendentals = B * (64 + 32 + 8)
    bytes_accessed = (2 * B * EMBED_DIM * 4             # f32 xq, xr reads
                      + B * NUM_CLASSES * 4             # f32 output writes
                      + (EMBED_DIM * 64 + 64 * 32 + 32 * 8 + 8 * NUM_CLASSES) * 4)

    out = pl.pallas_call(
        mlp_kernel,
        out_shape=jax.ShapeDtypeStruct((B, NUM_CLASSES), jnp.float32),
        grid=grid,
        in_specs=[act_spec, act_spec,
                  resident_spec(w0k), resident_spec(b0),
                  resident_spec(w1), resident_spec(b1),
                  resident_spec(w2), resident_spec(b2),
                  resident_spec(w3), resident_spec(b3)],
        out_specs=pl.BlockSpec((tb, NUM_CLASSES), lambda i: (i, 0)),
        compiler_params=pltpu.CompilerParams(
            dimension_semantics=("parallel",),
            # TB=2048 double-buffered f32 inputs ~25 MiB; raise above v5e's 16 MiB
            # scoped default, stay under v7x's 64 MiB physical.
            vmem_limit_bytes=48 * 1024 * 1024),
        cost_estimate=pl.CostEstimate(
            flops=flops,
            transcendentals=transcendentals,
            bytes_accessed=bytes_accessed),
    )(xq, xr, w0k, b0, w1, b1, w2, b2, w3, b3)

    return out


def init_params(key):
    """Deterministic PyTorch-style Linear init: U(-1/sqrt(fan_in), 1/sqrt(fan_in))."""
    dims = [EMBED_DIM] + MLP_HIDDEN_DIM + [NUM_CLASSES]
    params = []
    for i in range(len(dims) - 1):
        fan_in, fan_out = dims[i], dims[i + 1]
        key, kw, kb = jax.random.split(key, 3)
        bound = 1.0 / (fan_in ** 0.5)
        # Stored as (in, out) so the kernel does x @ W.
        w = jax.random.uniform(kw, (fan_in, fan_out), jnp.float32, -bound, bound)
        b = jax.random.uniform(kb, (1, fan_out), jnp.float32, -bound, bound)
        params.append((w, b))
    return params


def reference_forward(xq, xr, params):
    x = (xq + xr) / 2.0
    (w0, b0), (w1, b1), (w2, b2), (w3, b3) = params
    h0 = jnp.tanh(x @ w0 + b0)
    h1 = jnp.tanh(h0 @ w1 + b1)
    h2 = jnp.tanh(h1 @ w2 + b2)
    return h2 @ w3 + b3


if __name__ == "__main__":
    key = jax.random.PRNGKey(0)
    key, kq, kr, kp = jax.random.split(key, 4)
    params = init_params(kp)

    # Small aligned batch.
    batch = 8
    xq = jax.random.normal(kq, (batch, EMBED_DIM), jnp.float32)
    xr = jax.random.normal(kr, (batch, EMBED_DIM), jnp.float32)

    out = bilstm_mlp_forward(xq, xr, params)
    out = jax.block_until_ready(out)
    ref = reference_forward(xq, xr, params)
    assert out.shape == (batch, NUM_CLASSES), out.shape
    assert jnp.allclose(out, ref, atol=2e-2, rtol=2e-2), "mismatch vs reference (aligned)"

    # Ragged batch (not a multiple of the sublane-aligned tile) to exercise the
    # partial trailing block path (padded reads, masked writes).
    key, kq2, kr2 = jax.random.split(key, 3)
    batch2 = 12
    xq2 = jax.random.normal(kq2, (batch2, EMBED_DIM), jnp.float32)
    xr2 = jax.random.normal(kr2, (batch2, EMBED_DIM), jnp.float32)

    out2 = bilstm_mlp_forward(xq2, xr2, params)
    out2 = jax.block_until_ready(out2)
    ref2 = reference_forward(xq2, xr2, params)
    assert out2.shape == (batch2, NUM_CLASSES), out2.shape
    assert jnp.allclose(out2, ref2, atol=2e-2, rtol=2e-2), "mismatch vs reference (ragged)"

    print("KERNEL_OK")
</pallas_src>

<mosaic_0001>
module attributes {stable_mosaic.version = 11 : i64} {
  func.func @mlp_kernel(%arg0: i32, %arg1: memref<8x768xf32, #tpu.memory_space<vmem>>, %arg2: memref<8x768xf32, #tpu.memory_space<vmem>>, %arg3: memref<768x64xf32, #tpu.memory_space<vmem>>, %arg4: memref<1x64xf32, #tpu.memory_space<vmem>>, %arg5: memref<64x32xf32, #tpu.memory_space<vmem>>, %arg6: memref<1x32xf32, #tpu.memory_space<vmem>>, %arg7: memref<32x8xf32, #tpu.memory_space<vmem>>, %arg8: memref<1x8xf32, #tpu.memory_space<vmem>>, %arg9: memref<8x2xf32, #tpu.memory_space<vmem>>, %arg10: memref<1x2xf32, #tpu.memory_space<vmem>>, %arg11: memref<8x2xf32, #tpu.memory_space<vmem>>) attributes {dimension_semantics = [#tpu.dimension_semantics<parallel>], iteration_bounds = array<i64: 1>, scalar_prefetch = 0 : i64, scratch_operands = 0 : i64, tpu.core_type = #tpu.core_type<tc>, window_params = [{transform_indices = @transform_0, window_bounds = array<i64: 8, 768>}, {transform_indices = @transform_1, window_bounds = array<i64: 8, 768>}, {pipeline_mode = #tpu.pipeline_mode<synchronous>, transform_indices = @transform_2, window_bounds = array<i64: 768, 64>}, {pipeline_mode = #tpu.pipeline_mode<synchronous>, transform_indices = @transform_3, window_bounds = array<i64: 1, 64>}, {pipeline_mode = #tpu.pipeline_mode<synchronous>, transform_indices = @transform_4, window_bounds = array<i64: 64, 32>}, {pipeline_mode = #tpu.pipeline_mode<synchronous>, transform_indices = @transform_5, window_bounds = array<i64: 1, 32>}, {pipeline_mode = #tpu.pipeline_mode<synchronous>, transform_indices = @transform_6, window_bounds = array<i64: 32, 8>}, {pipeline_mode = #tpu.pipeline_mode<synchronous>, transform_indices = @transform_7, window_bounds = array<i64: 1, 8>}, {pipeline_mode = #tpu.pipeline_mode<synchronous>, transform_indices = @transform_8, window_bounds = array<i64: 8, 2>}, {pipeline_mode = #tpu.pipeline_mode<synchronous>, transform_indices = @transform_9, window_bounds = array<i64: 1, 2>}, {transform_indices = @transform_10, window_bounds = array<i64: 8, 2>}]} {
    %c0 = arith.constant 0 : index
    %c0_0 = arith.constant 0 : index
    %0 = vector.load %arg1[%c0, %c0_0] : memref<8x768xf32, #tpu.memory_space<vmem>>, vector<8x768xf32>
    %c0_1 = arith.constant 0 : index
    %c0_2 = arith.constant 0 : index
    %1 = vector.load %arg3[%c0_1, %c0_2] : memref<768x64xf32, #tpu.memory_space<vmem>>, vector<768x64xf32>
    %cst = arith.constant dense<0.000000e+00> : vector<8x64xf32>
    %2 = tpu.matmul %0, %1, %cst {dimension_numbers = #tpu.dot_dimension_numbers<[1], [0], [0], [1], [0, 0, 1, 1], [], []>} : vector<8x768xf32>, vector<768x64xf32>, vector<8x64xf32> -> vector<8x64xf32>
    %c0_3 = arith.constant 0 : index
    %c0_4 = arith.constant 0 : index
    %3 = vector.load %arg2[%c0_3, %c0_4] : memref<8x768xf32, #tpu.memory_space<vmem>>, vector<8x768xf32>
    %c0_5 = arith.constant 0 : index
    %c0_6 = arith.constant 0 : index
    %4 = vector.load %arg3[%c0_5, %c0_6] : memref<768x64xf32, #tpu.memory_space<vmem>>, vector<768x64xf32>
    %cst_7 = arith.constant dense<0.000000e+00> : vector<8x64xf32>
    %5 = tpu.matmul %3, %4, %cst_7 {dimension_numbers = #tpu.dot_dimension_numbers<[1], [0], [0], [1], [0, 0, 1, 1], [], []>} : vector<8x768xf32>, vector<768x64xf32>, vector<8x64xf32> -> vector<8x64xf32>
    %6 = arith.addf %2, %5 : vector<8x64xf32>
    %c0_8 = arith.constant 0 : index
    %c0_9 = arith.constant 0 : index
    %7 = vector.load %arg4[%c0_8, %c0_9] : memref<1x64xf32, #tpu.memory_space<vmem>>, vector<1x64xf32>
    %8 = vector.broadcast %7 : vector<1x64xf32> to vector<8x64xf32>
    %9 = arith.addf %6, %8 : vector<8x64xf32>
    %10 = math.tanh %9 : vector<8x64xf32>
    %c0_10 = arith.constant 0 : index
    %c0_11 = arith.constant 0 : index
    %11 = vector.load %arg5[%c0_10, %c0_11] : memref<64x32xf32, #tpu.memory_space<vmem>>, vector<64x32xf32>
    %cst_12 = arith.constant dense<0.000000e+00> : vector<8x32xf32>
    %12 = tpu.matmul %10, %11, %cst_12 {dimension_numbers = #tpu.dot_dimension_numbers<[1], [0], [0], [1], [0, 0, 1, 1], [], []>} : vector<8x64xf32>, vector<64x32xf32>, vector<8x32xf32> -> vector<8x32xf32>
    %c0_13 = arith.constant 0 : index
    %c0_14 = arith.constant 0 : index
    %13 = vector.load %arg6[%c0_13, %c0_14] : memref<1x32xf32, #tpu.memory_space<vmem>>, vector<1x32xf32>
    %14 = vector.broadcast %13 : vector<1x32xf32> to vector<8x32xf32>
    %15 = arith.addf %12, %14 : vector<8x32xf32>
    %16 = math.tanh %15 : vector<8x32xf32>
    %c0_15 = arith.constant 0 : index
    %c0_16 = arith.constant 0 : index
    %17 = vector.load %arg7[%c0_15, %c0_16] : memref<32x8xf32, #tpu.memory_space<vmem>>, vector<32x8xf32>
    %cst_17 = arith.constant dense<0.000000e+00> : vector<8x8xf32>
    %18 = tpu.matmul %16, %17, %cst_17 {dimension_numbers = #tpu.dot_dimension_numbers<[1], [0], [0], [1], [0, 0, 1, 1], [], []>} : vector<8x32xf32>, vector<32x8xf32>, vector<8x8xf32> -> vector<8x8xf32>
    %c0_18 = arith.constant 0 : index
    %c0_19 = arith.constant 0 : index
    %19 = vector.load %arg8[%c0_18, %c0_19] : memref<1x8xf32, #tpu.memory_space<vmem>>, vector<1x8xf32>
    %20 = vector.broadcast %19 : vector<1x8xf32> to vector<8x8xf32>
    %21 = arith.addf %18, %20 : vector<8x8xf32>
    %22 = math.tanh %21 : vector<8x8xf32>
    %c0_20 = arith.constant 0 : index
    %c0_21 = arith.constant 0 : index
    %23 = vector.load %arg9[%c0_20, %c0_21] : memref<8x2xf32, #tpu.memory_space<vmem>>, vector<8x2xf32>
    %cst_22 = arith.constant dense<0.000000e+00> : vector<8x2xf32>
    %24 = tpu.matmul %22, %23, %cst_22 {dimension_numbers = #tpu.dot_dimension_numbers<[1], [0], [0], [1], [0, 0, 1, 1], [], []>} : vector<8x8xf32>, vector<8x2xf32>, vector<8x2xf32> -> vector<8x2xf32>
    %c0_23 = arith.constant 0 : index
    %c0_24 = arith.constant 0 : index
    %25 = vector.load %arg10[%c0_23, %c0_24] : memref<1x2xf32, #tpu.memory_space<vmem>>, vector<1x2xf32>
    %26 = vector.broadcast %25 : vector<1x2xf32> to vector<8x2xf32>
    %27 = arith.addf %24, %26 : vector<8x2xf32>
    %c0_25 = arith.constant 0 : index
    %c0_26 = arith.constant 0 : index
    %28 = vector.load %arg11[%c0_25, %c0_26] : memref<8x2xf32, #tpu.memory_space<vmem>>, vector<8x2xf32>
    tpu.vector_store %arg11[%c0_25, %c0_26], %27 {strides = array<i32>} : memref<8x2xf32, #tpu.memory_space<vmem>>, vector<8x2xf32>,
    return
  }
  func.func @transform_0(%arg0: i32) -> (i32, i32) {
    %c0_i32 = arith.constant 0 : i32
    %c0_i32_0 = arith.constant 0 : i32
    return %arg0, %c0_i32 : i32, i32
  }
  func.func @transform_1(%arg0: i32) -> (i32, i32) {
    %c0_i32 = arith.constant 0 : i32
    %c0_i32_0 = arith.constant 0 : i32
    return %arg0, %c0_i32 : i32, i32
  }
  func.func @transform_2(%arg0: i32) -> (i32, i32) {
    %c0_i32 = arith.constant 0 : i32
    %c0_i32_0 = arith.constant 0 : i32
    %c0_i32_1 = arith.constant 0 : i32
    return %c0_i32, %c0_i32_0 : i32, i32
  }
  func.func @transform_3(%arg0: i32) -> (i32, i32) {
    %c0_i32 = arith.constant 0 : i32
    %c0_i32_0 = arith.constant 0 : i32
    %c0_i32_1 = arith.constant 0 : i32
    return %c0_i32, %c0_i32_0 : i32, i32
  }
  func.func @transform_4(%arg0: i32) -> (i32, i32) {
    %c0_i32 = arith.constant 0 : i32
    %c0_i32_0 = arith.constant 0 : i32
    %c0_i32_1 = arith.constant 0 : i32
    return %c0_i32, %c0_i32_0 : i32, i32
  }
  func.func @transform_5(%arg0: i32) -> (i32, i32) {
    %c0_i32 = arith.constant 0 : i32
    %c0_i32_0 = arith.constant 0 : i32
    %c0_i32_1 = arith.constant 0 : i32
    return %c0_i32, %c0_i32_0 : i32, i32
  }
  func.func @transform_6(%arg0: i32) -> (i32, i32) {
    %c0_i32 = arith.constant 0 : i32
    %c0_i32_0 = arith.constant 0 : i32
    %c0_i32_1 = arith.constant 0 : i32
    return %c0_i32, %c0_i32_0 : i32, i32
  }
  func.func @transform_7(%arg0: i32) -> (i32, i32) {
    %c0_i32 = arith.constant 0 : i32
    %c0_i32_0 = arith.constant 0 : i32
    %c0_i32_1 = arith.constant 0 : i32
    return %c0_i32, %c0_i32_0 : i32, i32
  }
  func.func @transform_8(%arg0: i32) -> (i32, i32) {
    %c0_i32 = arith.constant 0 : i32
    %c0_i32_0 = arith.constant 0 : i32
    %c0_i32_1 = arith.constant 0 : i32
    return %c0_i32, %c0_i32_0 : i32, i32
  }
  func.func @transform_9(%arg0: i32) -> (i32, i32) {
    %c0_i32 = arith.constant 0 : i32
    %c0_i32_0 = arith.constant 0 : i32
    %c0_i32_1 = arith.constant 0 : i32
    return %c0_i32, %c0_i32_0 : i32, i32
  }
  func.func @transform_10(%arg0: i32) -> (i32, i32) {
    %c0_i32 = arith.constant 0 : i32
    %c0_i32_0 = arith.constant 0 : i32
    return %arg0, %c0_i32 : i32, i32
  }
}

</mosaic_0001>

<bundles_post_ra>
// kernel: tpu_custom_call.1
= control target key start
LH: loop header
LB: loop body
LE: loop exit
PB: predicated region body
PF: predicated region fallthrough
CT: control target
= control target key end

     0   :  { %vm401_vm0 = vcmask 523264   ;;  %vm434_vm1 = vcmask 261120   ;;  %vm464_vm2 = vcmask 64512   ;;  %vm488_vm3 = vcmask 15360   ;;  %s1324_s2 = inlined_call_operand.vmem [shape: f32[768,64], index: 2, kind: input, shape index: {}]   ;;  %s1325_s1 = inlined_call_operand.vmem [shape: f32[8,768], index: 1, kind: input, shape index: {}]   ;;  %s1326_s0 = inlined_call_operand.vmem [shape: f32[8,768], index: 0, kind: input, shape index: {}]   ;;  %s1327_s3 = inlined_call_operand.vmem [shape: f32[1,64], index: 3, kind: input, shape index: {}]   ;;  %s1328_s5 = inlined_call_operand.vmem [shape: f32[1,32], index: 5, kind: input, shape index: {}]   ;;  %s1329_s4 = inlined_call_operand.vmem [shape: f32[64,32], index: 4, kind: input, shape index: {}]   ;;  %s1330_s7 = inlined_call_operand.vmem [shape: f32[1,8], index: 7, kind: input, shape index: {}]   ;;  %s1331_s6 = inlined_call_operand.vmem [shape: f32[32,8], index: 6, kind: input, shape index: {}]   ;;  %s1332_s9 = inlined_call_operand.vmem [shape: f32[1,2], index: 9, kind: input, shape index: {}]   ;;  %s1333_s8 = inlined_call_operand.vmem [shape: f32[8,2], index: 8, kind: input, shape index: {}]   ;;  %s1334_s10 = inlined_call_operand.vmem [shape: f32[8,2], index: 10, kind: output, shape index: {}]  }
   0x1   :  { %v565_v0 = vld [vmem:[%s1324_s2 + $0x78] sm:$0xff]  ;;  %v575_v2 = vld [vmem:[%s1324_s2 + $0x70] sm:$0xff]  ;;  %v599_v6 = vld [vmem:[%s1324_s2 + $0x68] sm:$0xff] }
   0x2   :  { %v570_v1 = vld [vmem:[%s1324_s2 + $0x178] sm:$0xff]  ;;  %143 = vmatpush.msra.mxu0 %v565_v0  ;;  %v587_v4 = vld [vmem:[%s1324_s2 + $0x170] sm:$0xff]  ;;  %v609_v8 = vld [vmem:[%s1324_s2 + $0x168] sm:$0xff] }
   0x3   :  { %183 = vmatpush.msra.mxu2 %v570_v1  ;;  %v582_v3 = vld [vmem:[%s1324_s2 + $0xf8] sm:$0xff]  ;;  %v604_v7 = vld [vmem:[%s1324_s2 + $0xf0] sm:$0xff]  ;;  %v621_v10 = vld [vmem:[%s1324_s2 + $0xe8] sm:$0xff] }
   0x4   :  { %v592_v5 = vld [vmem:[%s1324_s2 + $0x1f8] sm:$0xff]  ;;  %163 = vmatpush.msra.mxu1 %v582_v3  ;;  %144 = vmatpush.msra.mxu0 %v575_v2  ;;  %v616_v9 = vld [vmem:[%s1324_s2 + $0x1f0] sm:$0xff]  ;;  %v628_v11 = vld [vmem:[%s1324_s2 + $0x60] sm:$0xff] }
   0x5   :  { %203 = vmatpush.msra.mxu3 %v592_v5  ;;  %184 = vmatpush.msra.mxu2 %v587_v4  ;;  %v633_v12 = vld [vmem:[%s1324_s2 + $0x160] sm:$0xff]  ;;  %v638_v13 = vld [vmem:[%s1324_s2 + $0x1e8] sm:$0xff]  ;;  %v657_v16 = vld [vmem:[%s1324_s2 + $0x58] sm:$0xff] }
   0x6   :  { %164 = vmatpush.msra.mxu1 %v604_v7  ;;  %145 = vmatpush.msra.mxu0 %v599_v6  ;;  %v645_v14 = vld [vmem:[%s1324_s2 + $0xe0] sm:$0xff]  ;;  %v662_v17 = vld [vmem:[%s1324_s2 + $0x158] sm:$0xff]  ;;  %v681_v20 = vld [vmem:[%s1324_s2 + $0x50] sm:$0xff] }
   0x7   :  { %204 = vmatpush.msra.mxu3 %v616_v9  ;;  %185 = vmatpush.msra.mxu2 %v609_v8  ;;  %v650_v15 = vld [vmem:[%s1324_s2 + $0x1e0] sm:$0xff]  ;;  %v669_v18 = vld [vmem:[%s1324_s2 + $0xd8] sm:$0xff]  ;;  %v686_v21 = vld [vmem:[%s1324_s2 + $0x150] sm:$0xff] }
   0x8   :  { %165 = vmatpush.msra.mxu1 %v621_v10  ;;  %146 = vmatpush.msra.mxu0 %v628_v11  ;;  %v674_v19 = vld [vmem:[%s1324_s2 + $0x1d8] sm:$0xff]  ;;  %v693_v22 = vld [vmem:[%s1324_s2 + $0xd0] sm:$0xff]  ;;  %v705_v24 = vld [vmem:[%s1324_s2 + $0x48] sm:$0xff] }
   0x9   :  { %205 = vmatpush.msra.mxu3 %v638_v13  ;;  %186 = vmatpush.msra.mxu2 %v633_v12  ;;  %v698_v23 = vld [vmem:[%s1324_s2 + $0x1d0] sm:$0xff]  ;;  %v710_v25 = vld [vmem:[%s1324_s2 + $0x148] sm:$0xff]  ;;  %v729_v28 = vld [vmem:[%s1324_s2 + $0x40] sm:$0xff] }
   0xa   :  { %166 = vmatpush.msra.mxu1 %v645_v14  ;;  %147 = vmatpush.msra.mxu0 %v657_v16  ;;  %v717_v26 = vld [vmem:[%s1324_s2 + $0xc8] sm:$0xff]  ;;  %v734_v29 = vld [vmem:[%s1324_s2 + $0x140] sm:$0xff]  ;;  %v753_v32 = vld [vmem:[%s1324_s2 + $0x38] sm:$0xff] }
   0xb   :  { %206 = vmatpush.msra.mxu3 %v650_v15  ;;  %187 = vmatpush.msra.mxu2 %v662_v17  ;;  %v722_v27 = vld [vmem:[%s1324_s2 + $0x1c8] sm:$0xff]  ;;  %v741_v30 = vld [vmem:[%s1324_s2 + $0xc0] sm:$0xff]  ;;  %v758_v33 = vld [vmem:[%s1324_s2 + $0x138] sm:$0xff] }
   0xc   :  { %167 = vmatpush.msra.mxu1 %v669_v18  ;;  %148 = vmatpush.msra.mxu0 %v681_v20  ;;  %v746_v31 = vld [vmem:[%s1324_s2 + $0x1c0] sm:$0xff]  ;;  %v765_v34 = vld [vmem:[%s1324_s2 + $0xb8] sm:$0xff]  ;;  %v777_v36 = vld [vmem:[%s1324_s2 + $0x30] sm:$0xff] }
   0xd   :  { %207 = vmatpush.msra.mxu3 %v674_v19  ;;  %188 = vmatpush.msra.mxu2 %v686_v21  ;;  %v770_v35 = vld [vmem:[%s1324_s2 + $0x1b8] sm:$0xff]  ;;  %v782_v37 = vld [vmem:[%s1324_s2 + $0x130] sm:$0xff]  ;;  %v801_v40 = vld [vmem:[%s1324_s2 + $0x28] sm:$0xff] }
   0xe   :  { %168 = vmatpush.msra.mxu1 %v693_v22  ;;  %149 = vmatpush.msra.mxu0 %v705_v24  ;;  %v789_v38 = vld [vmem:[%s1324_s2 + $0xb0] sm:$0xff]  ;;  %v806_v41 = vld [vmem:[%s1324_s2 + $0x128] sm:$0xff]  ;;  %v825_v44 = vld [vmem:[%s1324_s2 + $0x20] sm:$0xff] }
   0xf   :  { %208 = vmatpush.msra.mxu3 %v698_v23  ;;  %189 = vmatpush.msra.mxu2 %v710_v25  ;;  %v794_v39 = vld [vmem:[%s1324_s2 + $0x1b0] sm:$0xff]  ;;  %v813_v42 = vld [vmem:[%s1324_s2 + $0xa8] sm:$0xff]  ;;  %v830_v45 = vld [vmem:[%s1324_s2 + $0x120] sm:$0xff] }
  0x10   :  { %169 = vmatpush.msra.mxu1 %v717_v26  ;;  %150 = vmatpush.msra.mxu0 %v729_v28  ;;  %v818_v43 = vld [vmem:[%s1324_s2 + $0x1a8] sm:$0xff]  ;;  %v837_v46 = vld [vmem:[%s1324_s2 + $0xa0] sm:$0xff]  ;;  %v849_v48 = vld [vmem:[%s1324_s2 + $0x18] sm:$0xff] }
  0x11   :  { %209 = vmatpush.msra.mxu3 %v722_v27  ;;  %190 = vmatpush.msra.mxu2 %v734_v29  ;;  %v842_v47 = vld [vmem:[%s1324_s2 + $0x1a0] sm:$0xff]  ;;  %v854_v49 = vld [vmem:[%s1324_s2 + $0x118] sm:$0xff]  ;;  %v873_v52 = vld [vmem:[%s1324_s2 + $0x10] sm:$0xff] }
  0x12   :  { %170 = vmatpush.msra.mxu1 %v741_v30  ;;  %151 = vmatpush.msra.mxu0 %v753_v32  ;;  %v861_v50 = vld [vmem:[%s1324_s2 + $0x98] sm:$0xff]  ;;  %v878_v53 = vld [vmem:[%s1324_s2 + $0x110] sm:$0xff]  ;;  %v897_v56 = vld [vmem:[%s1324_s2 + $0x8] sm:$0xff] }
  0x13   :  { %210 = vmatpush.msra.mxu3 %v746_v31  ;;  %191 = vmatpush.msra.mxu2 %v758_v33  ;;  %v866_v51 = vld [vmem:[%s1324_s2 + $0x198] sm:$0xff]  ;;  %v885_v54 = vld [vmem:[%s1324_s2 + $0x90] sm:$0xff]  ;;  %v902_v57 = vld [vmem:[%s1324_s2 + $0x108] sm:$0xff] }
  0x14   :  { %171 = vmatpush.msra.mxu1 %v765_v34  ;;  %152 = vmatpush.msra.mxu0 %v777_v36  ;;  %1342 = vst [vmem:[#allocation2_spill] sm:$0xff] %v866_v51  ;;  %v890_v55 = vld [vmem:[%s1324_s2 + $0x190] sm:$0xff]  ;;  %v909_v58 = vld [vmem:[%s1324_s2 + $0x88] sm:$0xff]  ;;  %v921_v60 = vld [vmem:[%s1324_s2] sm:$0xff] }
  0x15   :  { %211 = vmatpush.msra.mxu3 %v770_v35  ;;  %192 = vmatpush.msra.mxu2 %v782_v37  ;;  %1343 = vst [vmem:[#allocation3_spill] sm:$0xff] %v890_v55  ;;  %v914_v59 = vld [vmem:[%s1324_s2 + $0x188] sm:$0xff]  ;;  %v926_v61 = vld [vmem:[%s1324_s2 + $0x100] sm:$0xff]  ;;  %v933_v62 = vld [vmem:[%s1324_s2 + $0x278] sm:$0xff] }
  0x16   :  { %172 = vmatpush.msra.mxu1 %v789_v38  ;;  %153 = vmatpush.msra.mxu0 %v801_v40  ;;  %1344 = vst [vmem:[#allocation4_spill] sm:$0xff] %v902_v57  ;;  %v940_v63 = vld [vmem:[%s1324_s2 + $0x80] sm:$0xff] }
  0x17   :  { %212 = vmatpush.msra.mxu3 %v794_v39  ;;  %193 = vmatpush.msra.mxu2 %v806_v41  ;;  %1345 = vst [vmem:[#allocation5_spill] sm:$0xff] %v914_v59 }
  0x18   :  { %173 = vmatpush.msra.mxu1 %v813_v42  ;;  %154 = vmatpush.msra.mxu0 %v825_v44  ;;  %1346 = vst [vmem:[#allocation6_spill] sm:$0xff] %v926_v61 }
  0x19   :  { %213 = vmatpush.msra.mxu3 %v818_v43  ;;  %194 = vmatpush.msra.mxu2 %v830_v45 }
  0x1a   :  { %174 = vmatpush.msra.mxu1 %v837_v46  ;;  %155 = vmatpush.msra.mxu0 %v849_v48 }
  0x1b   :  { %214 = vmatpush.msra.mxu3 %v842_v47  ;;  %195 = vmatpush.msra.mxu2 %v854_v49 }
  0x1c   :  { %175 = vmatpush.msra.mxu1 %v861_v50  ;;  %156 = vmatpush.msra.mxu0 %v873_v52 }
  0x1d   :  { %215 = vmatpush.msra.mxu3 %v866_v51  ;;  %196 = vmatpush.msra.mxu2 %v878_v53  ;;  %v971_v51 = vld [vmem:[%s1324_s2 + $0x2f0] sm:$0xff] }
  0x1e   :  { %176 = vmatpush.msra.mxu1 %v885_v54  ;;  %157 = vmatpush.msra.mxu0 %v897_v56 }
  0x1f   :  { %216 = vmatpush.msra.mxu3 %v890_v55  ;;  %197 = vmatpush.msra.mxu2 %v902_v57  ;;  %v945_v55 = vld [vmem:[%s1324_s2 + $0x180] sm:$0xff]  ;;  %v952_v57 = vld [vmem:[%s1324_s2 + $0x270] sm:$0xff] }
  0x20   :  { %177 = vmatpush.msra.mxu1 %v909_v58  ;;  %1347 = vst [vmem:[#allocation7_spill] sm:$0xff] %v945_v55  ;;  %158 = vmatpush.msra.mxu0 %v921_v60 }
  0x21   :  { %217 = vmatpush.msra.mxu3 %v914_v59  ;;  %198 = vmatpush.msra.mxu2 %v926_v61  ;;  %v957_v59 = vld [vmem:[%s1324_s2 + $0x2f8] sm:$0xff]  ;;  %v966_v61 = vld [vmem:[%s1324_s2 + $0x268] sm:$0xff] }
  0x22   :  { %223 = vmatpush.msrb.mxu0 %v933_v62  ;;  %178 = vmatpush.msra.mxu1 %v940_v63 }
  0x23   :  { %263 = vmatpush.msrb.mxu2 %v565_v0  ;;  %218 = vmatpush.msra.mxu3 %v945_v55  ;;  %v980_v0 = vld [vmem:[%s1324_s2 + $0x260] sm:$0xff]  ;;  %v985_v55 = vld [vmem:[%s1324_s2 + $0x2e8] sm:$0xff] }
  0x24   :  { %224 = vmatpush.msrb.mxu0 %v952_v57  ;;  %243 = vmatpush.msrb.mxu1 %v957_v59 }
  0x25   :  { %264 = vmatpush.msrb.mxu2 %v575_v2  ;;  %283 = vmatpush.msrb.mxu3 %v582_v3  ;;  %v994_v2 = vld [vmem:[%s1324_s2 + $0x258] sm:$0xff]  ;;  %v999_v3 = vld [vmem:[%s1324_s2 + $0x2e0] sm:$0xff] }
  0x26   :  { %225 = vmatpush.msrb.mxu0 %v966_v61  ;;  %244 = vmatpush.msrb.mxu1 %v971_v51 }
  0x27   :  { %265 = vmatpush.msrb.mxu2 %v599_v6  ;;  %284 = vmatpush.msrb.mxu3 %v604_v7  ;;  %v1008_v6 = vld [vmem:[%s1324_s2 + $0x250] sm:$0xff]  ;;  %v1013_v7 = vld [vmem:[%s1324_s2 + $0x2d8] sm:$0xff] }
  0x28   :  { %226 = vmatpush.msrb.mxu0 %v980_v0  ;;  %245 = vmatpush.msrb.mxu1 %v985_v55 }
  0x29   :  { %266 = vmatpush.msrb.mxu2 %v628_v11  ;;  %285 = vmatpush.msrb.mxu3 %v621_v10  ;;  %v1022_v10 = vld [vmem:[%s1324_s2 + $0x248] sm:$0xff]  ;;  %v1027_v11 = vld [vmem:[%s1324_s2 + $0x2d0] sm:$0xff] }
  0x2a   :  { %227 = vmatpush.msrb.mxu0 %v994_v2  ;;  %246 = vmatpush.msrb.mxu1 %v999_v3 }
  0x2b   :  { %267 = vmatpush.msrb.mxu2 %v657_v16  ;;  %286 = vmatpush.msrb.mxu3 %v645_v14  ;;  %v1036_v14 = vld [vmem:[%s1324_s2 + $0x240] sm:$0xff]  ;;  %v1041_v16 = vld [vmem:[%s1324_s2 + $0x2c8] sm:$0xff] }
  0x2c   :  { %228 = vmatpush.msrb.mxu0 %v1008_v6  ;;  %247 = vmatpush.msrb.mxu1 %v1013_v7 }
  0x2d   :  { %268 = vmatpush.msrb.mxu2 %v681_v20  ;;  %287 = vmatpush.msrb.mxu3 %v669_v18  ;;  %v1050_v18 = vld [vmem:[%s1324_s2 + $0x238] sm:$0xff]  ;;  %v1055_v20 = vld [vmem:[%s1324_s2 + $0x2c0] sm:$0xff] }
  0x2e   :  { %229 = vmatpush.msrb.mxu0 %v1022_v10  ;;  %248 = vmatpush.msrb.mxu1 %v1027_v11 }
  0x2f   :  { %269 = vmatpush.msrb.mxu2 %v705_v24  ;;  %288 = vmatpush.msrb.mxu3 %v693_v22  ;;  %v1064_v22 = vld [vmem:[%s1324_s2 + $0x230] sm:$0xff]  ;;  %v1069_v24 = vld [vmem:[%s1324_s2 + $0x2b8] sm:$0xff] }
  0x30   :  { %230 = vmatpush.msrb.mxu0 %v1036_v14  ;;  %249 = vmatpush.msrb.mxu1 %v1041_v16 }
  0x31   :  { %270 = vmatpush.msrb.mxu2 %v729_v28  ;;  %289 = vmatpush.msrb.mxu3 %v717_v26  ;;  %v1078_v26 = vld [vmem:[%s1324_s2 + $0x228] sm:$0xff]  ;;  %v1083_v28 = vld [vmem:[%s1324_s2 + $0x2b0] sm:$0xff] }
  0x32   :  { %231 = vmatpush.msrb.mxu0 %v1050_v18  ;;  %250 = vmatpush.msrb.mxu1 %v1055_v20 }
  0x33   :  { %271 = vmatpush.msrb.mxu2 %v753_v32  ;;  %290 = vmatpush.msrb.mxu3 %v741_v30  ;;  %v1092_v30 = vld [vmem:[%s1324_s2 + $0x220] sm:$0xff]  ;;  %v1097_v32 = vld [vmem:[%s1324_s2 + $0x2a8] sm:$0xff] }
  0x34   :  { %232 = vmatpush.msrb.mxu0 %v1064_v22  ;;  %251 = vmatpush.msrb.mxu1 %v1069_v24 }
  0x35   :  { %272 = vmatpush.msrb.mxu2 %v777_v36  ;;  %291 = vmatpush.msrb.mxu3 %v765_v34  ;;  %v1106_v34 = vld [vmem:[%s1324_s2 + $0x218] sm:$0xff]  ;;  %v1111_v36 = vld [vmem:[%s1324_s2 + $0x2a0] sm:$0xff] }
  0x36   :  { %233 = vmatpush.msrb.mxu0 %v1078_v26  ;;  %252 = vmatpush.msrb.mxu1 %v1083_v28 }
  0x37   :  { %273 = vmatpush.msrb.mxu2 %v801_v40  ;;  %292 = vmatpush.msrb.mxu3 %v789_v38  ;;  %v1120_v38 = vld [vmem:[%s1324_s2 + $0x210] sm:$0xff]  ;;  %v1125_v40 = vld [vmem:[%s1324_s2 + $0x298] sm:$0xff] }
  0x38   :  { %234 = vmatpush.msrb.mxu0 %v1092_v30  ;;  %253 = vmatpush.msrb.mxu1 %v1097_v32  ;;  %1348 = vst [vmem:[#allocation8_spill] sm:$0xff] %v1125_v40 }
  0x39   :  { %274 = vmatpush.msrb.mxu2 %v825_v44  ;;  %293 = vmatpush.msrb.mxu3 %v813_v42  ;;  %v1134_v42 = vld [vmem:[%s1324_s2 + $0x208] sm:$0xff]  ;;  %v1139_v44 = vld [vmem:[%s1324_s2 + $0x290] sm:$0xff] }
  0x3a   :  { %235 = vmatpush.msrb.mxu0 %v1106_v34  ;;  %254 = vmatpush.msrb.mxu1 %v1111_v36 }
  0x3b   :  { %275 = vmatpush.msrb.mxu2 %v849_v48  ;;  %294 = vmatpush.msrb.mxu3 %v837_v46  ;;  %v139_v46 = vld [vmem:[%s1325_s1 + $0x10] sm:$0xff]  ;;  %v1151_v48 = vld [vmem:[%s1324_s2 + $0x200] sm:$0xff] }
  0x3c   :  { %236 = vmatpush.msrb.mxu0 %v1120_v38  ;;  %255 = vmatpush.msrb.mxu1 %v1125_v40  ;;  %v1158_v40 = vld [vmem:[%s1324_s2 + $0x288] sm:$0xff] }
  0x3d   :  { %276 = vmatpush.msrb.mxu2 %v873_v52  ;;  %295 = vmatpush.msrb.mxu3 %v861_v50  ;;  %v137_v50 = vld [vmem:[%s1325_s1] sm:$0xff]  ;;  %v140_v52 = vld [vmem:[%s1325_s1 + $0x18] sm:$0xff] }
  0x3e   :  { %237 = vmatpush.msrb.mxu0 %v1134_v42  ;;  %256 = vmatpush.msrb.mxu1 %v1139_v44 }
  0x3f   :  { %277 = vmatpush.msrb.mxu2 %v897_v56  ;;  %296 = vmatpush.msrb.mxu3 %v885_v54  ;;  %v1174_v56 = vld [vmem:[%s1324_s2 + $0x280] sm:$0xff]  ;;  %v138_v54 = vld [vmem:[%s1325_s1 + $0x8] sm:$0xff] }
  0x40   :  { %199 = vmatmul.f32.vlgmr.msra.gmra.mxu2 %v139_v46  ;;  %238 = vmatpush.msrb.mxu0 %v1151_v48  ;;  %v499_v46 = vld [vmem:[%s1330_s7] ss:$0 sm:$0xff] }
  0x41   :  { %257 = vmatpush.msrb.mxu1 %v1158_v40  ;;  %278 = vmatpush.msrb.mxu2 %v921_v60 }
  0x42   :  { %297 = vmatpush.msrb.mxu3 %v909_v58  ;;  %159 = vmatmul.f32.vlgmr.msra.gmra.mxu0 %v137_v50  ;;  %v35_v58 = vld [vmem:[%s1326_s0] sm:$0xff] }
  0x43   :  { %219 = vmatmul.f32.vlgmr.msra.gmra.mxu3 %v140_v52  ;;  %303 = vmatpush.msra.mxu0 %v570_v1  ;;  %v141_v1 = vld [vmem:[%s1325_s1 + $0x20] sm:$0xff] }
  0x44   :  { %343 = vmatpush.msra.mxu2 %v933_v62  ;;  %258 = vmatpush.msrb.mxu1 %v1174_v56 }
  0x45   :  { %298 = vmatpush.msrb.mxu3 %v940_v63  ;;  %179 = vmatmul.f32.vlgmr.msra.gmra.mxu1 %v138_v54 }
  0x46   :  { %304 = vmatpush.msra.mxu0 %v587_v4  ;;  %323 = vmatpush.msra.mxu1 %v592_v5  ;;  %v36_v4 = vld [vmem:[%s1326_s0 + $0x8] sm:$0xff] }
  0x47   :  { %344 = vmatpush.msra.mxu2 %v952_v57  ;;  %363 = vmatpush.msra.mxu3 %v957_v59  ;;  %v142_v5 = vld [vmem:[%s1325_s1 + $0x28] sm:$0xff]  ;;  %v389_v59 = vld [vmem:[%s1329_s4] sm:$0xff] }
  0x48   :  { %305 = vmatpush.msra.mxu0 %v609_v8  ;;  %324 = vmatpush.msra.mxu1 %v616_v9  ;;  %v1349_v8 = vld [vmem:[#allocation2_spill] sm:$0xff]  ;;  %v1350_v9 = vld [vmem:[#allocation8_spill] sm:$0xff] }
  0x49   :  { %345 = vmatpush.msra.mxu2 %v966_v61  ;;  %364 = vmatpush.msra.mxu3 %v971_v51  ;;  %v391_v51 = vld [vmem:[%s1329_s4 + $0x10] sm:$0xff] }
  0x4a   :  { %279 = vmatmul.f32.vlgmr.msrb.gmra.mxu2 %v35_v58  ;;  %306 = vmatpush.msra.mxu0 %v633_v12  ;;  %v1351_v12 = vld [vmem:[#allocation4_spill] sm:$0xff] }
  0x4b   :  { %325 = vmatpush.msra.mxu1 %v638_v13  ;;  %346 = vmatpush.msra.mxu2 %v980_v0  ;;  %v1352_v13 = vld [vmem:[#allocation3_spill] sm:$0xff] }
  0x4c   :  { %365 = vmatpush.msra.mxu3 %v985_v55  ;;  %239 = vmatmul.f32.vlgmr.msrb.gmra.mxu0 %v141_v1 }
  0x4d   :  { %299 = vmatmul.f32.vlgmr.msrb.gmra.mxu3 %v36_v4  ;;  %307 = vmatpush.msra.mxu0 %v662_v17  ;;  %v39_v17 = vld [vmem:[%s1326_s0 + $0x20] sm:$0xff] }
  0x4e   :  { %326 = vmatpush.msra.mxu1 %v650_v15  ;;  %347 = vmatpush.msra.mxu2 %v994_v2  ;;  %v37_v15 = vld [vmem:[%s1326_s0 + $0x10] sm:$0xff] }
  0x4f   :  { %366 = vmatpush.msra.mxu3 %v999_v3  ;;  %259 = vmatmul.f32.vlgmr.msrb.gmra.mxu1 %v142_v5 }
  0x50   :  { %308 = vmatpush.msra.mxu0 %v686_v21  ;;  %327 = vmatpush.msra.mxu1 %v674_v19  ;;  %v1353_v19 = vld [vmem:[#allocation6_spill] sm:$0xff]  ;;  %v1354_v21 = vld [vmem:[#allocation5_spill] sm:$0xff] }
  0x51   :  { %348 = vmatpush.msra.mxu2 %v1008_v6  ;;  %367 = vmatpush.msra.mxu3 %v1013_v7 }
  0x52   :  { %309 = vmatpush.msra.mxu0 %v710_v25  ;;  %328 = vmatpush.msra.mxu1 %v698_v23  ;;  %v38_v23 = vld [vmem:[%s1326_s0 + $0x18] sm:$0xff]  ;;  %v40_v25 = vld [vmem:[%s1326_s0 + $0x28] sm:$0xff] }
  0x53   :  { %349 = vmatpush.msra.mxu2 %v1022_v10  ;;  %368 = vmatpush.msra.mxu3 %v1027_v11 }
  0x54   :  { %310 = vmatpush.msra.mxu0 %v734_v29  ;;  %329 = vmatpush.msra.mxu1 %v722_v27  ;;  %v1355_v27 = vld [vmem:[#allocation7_spill] sm:$0xff]  ;;  %v396_v29 = vld [vmem:[%s1329_s4 + $0x38] sm:$0xff] }
  0x55   :  { %350 = vmatpush.msra.mxu2 %v1036_v14  ;;  %369 = vmatpush.msra.mxu3 %v1041_v16 }
  0x56   :  { %311 = vmatpush.msra.mxu0 %v758_v33  ;;  %330 = vmatpush.msra.mxu1 %v746_v31 }
  0x57   :  { %351 = vmatpush.msra.mxu2 %v1050_v18  ;;  %370 = vmatpush.msra.mxu3 %v1055_v20  ;;  %v497_v18 = vld [vmem:[%s1327_s3] ss:$0 sm:$0xff] }
  0x58   :  { %312 = vmatpush.msra.mxu0 %v782_v37  ;;  %331 = vmatpush.msra.mxu1 %v770_v35  ;;  %v395_v35 = vld [vmem:[%s1329_s4 + $0x30] sm:$0xff] }
  0x59   :  { %352 = vmatpush.msra.mxu2 %v1064_v22  ;;  %371 = vmatpush.msra.mxu3 %v1069_v24 }
  0x5a   :  { %313 = vmatpush.msra.mxu0 %v806_v41  ;;  %332 = vmatpush.msra.mxu1 %v794_v39  ;;  %v394_v41 = vld [vmem:[%s1329_s4 + $0x28] sm:$0xff] }
  0x5b   :  { %353 = vmatpush.msra.mxu2 %v1078_v26  ;;  %372 = vmatpush.msra.mxu3 %v1083_v28  ;;  %v429_v28 = vld [vmem:[%s1331_s6 + $0x18] sm:$0xff] }
  0x5c   :  { %314 = vmatpush.msra.mxu0 %v830_v45  ;;  %333 = vmatpush.msra.mxu1 %v818_v43  ;;  %v393_v43 = vld [vmem:[%s1329_s4 + $0x20] sm:$0xff] }
  0x5d   :  { %354 = vmatpush.msra.mxu2 %v1092_v30  ;;  %373 = vmatpush.msra.mxu3 %v1097_v32  ;;  %v428_v30 = vld [vmem:[%s1331_s6 + $0x10] sm:$0xff]  ;;  %v427_v32 = vld [vmem:[%s1331_s6 + $0x8] sm:$0xff] }
  0x5e   :  { %315 = vmatpush.msra.mxu0 %v854_v49  ;;  %334 = vmatpush.msra.mxu1 %v842_v47  ;;  %v392_v49 = vld [vmem:[%s1329_s4 + $0x18] sm:$0xff] }
  0x5f   :  { %355 = vmatpush.msra.mxu2 %v1106_v34  ;;  %374 = vmatpush.msra.mxu3 %v1111_v36  ;;  %v426_v34 = vld [vmem:[%s1331_s6] sm:$0xff] }
  0x60   :  { %316 = vmatpush.msra.mxu0 %v878_v53  ;;  %335 = vmatpush.msra.mxu1 %v1349_v8  ;;  %v390_v53 = vld [vmem:[%s1329_s4 + $0x8] sm:$0xff]  ;;  %v498_v36 = vld [vmem:[%s1328_s5] ss:$0 sm:$0xff] }
  0x61   :  { %356 = vmatpush.msra.mxu2 %v1120_v38  ;;  %375 = vmatpush.msra.mxu3 %v1350_v9 }
  0x62   :  { %317 = vmatpush.msra.mxu0 %v1351_v12  ;;  %336 = vmatpush.msra.mxu1 %v1352_v13 }
  0x63   :  { %357 = vmatpush.msra.mxu2 %v1134_v42  ;;  %376 = vmatpush.msra.mxu3 %v1139_v44  ;;  %v459_v44 = vld [vmem:[%s1333_s8] sm:$0xff] }
  0x64   :  { %318 = vmatpush.msra.mxu0 %v1353_v19  ;;  %337 = vmatpush.msra.mxu1 %v1354_v21 }
  0x65   :  { %358 = vmatpush.msra.mxu2 %v1151_v48  ;;  %377 = vmatpush.msra.mxu3 %v1158_v40 }
  0x66   :  { %319 = vmatmul.f32.vlgmr.msra.gmra.mxu0 %v37_v15  ;;  %359 = vmatmul.f32.vlgmr.msra.gmra.mxu2 %v39_v17 }
  0x67   :  { %338 = vmatpush.msra.mxu1 %v1355_v27  ;;  %378 = vmatpush.msra.mxu3 %v1174_v56  ;;  %v500_v56 = vld [vmem:[%s1332_s9] ss:$0 sm:$0xff] }
  0x68   :  { %339 = vmatmul.f32.vlgmr.msra.gmra.mxu1 %v38_v23  ;;  %379 = vmatmul.f32.vlgmr.msra.gmra.mxu3 %v40_v25 }
  0x69   :  { %413 = vmatpush.msrb.mxu0 %v396_v29  ;;  %450 = vmatpush.msrb.mxu1 %v429_v28 }
  0x6a   :  { %483 = vmatpush.msrb.mxu2 %v459_v44 }
  0x6b   :  { %414 = vmatpush.msrb.mxu0 %v395_v35  ;;  %451 = vmatpush.msrb.mxu1 %v428_v30 }
  0x6d   :  { %415 = vmatpush.msrb.mxu0 %v394_v41  ;;  %452 = vmatpush.msrb.mxu1 %v427_v32 }
  0x6f   :  { %416 = vmatpush.msrb.mxu0 %v393_v43  ;;  %453 = vmatpush.msrb.mxu1 %v426_v34 }
  0x71   :  { %417 = vmatpush.msrb.mxu0 %v392_v49 }
  0x73   :  { %418 = vmatpush.msrb.mxu0 %v391_v51 }
  0x75   :  { %419 = vmatpush.msrb.mxu0 %v390_v53 }
  0x77   :  { %420 = vmatpush.msrb.mxu0 %v389_v59 }
  0xbf   :  { %v160_v33 = vpop.f32.mrf.mxu0 }
  0xc2   :  { %v180_v31 = vpop.f32.mrf.mxu1 }
  0xc3   :  { %v181_v37 = vadd.f32 %v180_v31, %v160_v33  ;;  %v200_v39 = vpop.f32.mrf.mxu2 }
  0xc5   :  { %v201_v45 = vadd.f32 %v200_v39, %v181_v37 }
  0xc6   :  { %v220_v47 = vpop.f32.mrf.mxu3 }
  0xc7   :  { %v221_v55 = vadd.f32 %v220_v47, %v201_v45 }
  0xc9   :  { %v240_v57 = vpop.f32.mrf.mxu0 }
  0xca   :  { %v241_v60 = vadd.f32 %v240_v57, %v221_v55 }
  0xcc   :  { %v260_v61 = vpop.f32.mrf.mxu1 }
  0xcd   :  { %v261_v62 = vadd.f32 %v260_v61, %v241_v60  ;;  %v280_v63 = vpop.f32.mrf.mxu2 }
  0xcf   :  { %v281_v0 = vadd.f32 %v280_v63, %v261_v62 }
  0xd0   :  { %v300_v2 = vpop.f32.mrf.mxu3 }
  0xd1   :  { %v301_v3 = vadd.f32 %v300_v2, %v281_v0 }
  0xe3   :  { %v320_v6 = vpop.f32.mrf.mxu0 }
  0xe4   :  { %v321_v7 = vadd.f32 %v320_v6, %v301_v3 }
  0xe5   :  { %v340_v10 = vpop.f32.mrf.mxu1 }
  0xe6   :  { %v341_v11 = vadd.f32 %v340_v10, %v321_v7 }
  0xe9   :  { %v360_v14 = vpop.f32.mrf.mxu2 }
  0xea   :  { %v361_v16 = vadd.f32 %v360_v14, %v341_v11 }
  0xeb   :  { %v380_v20 = vpop.f32.mrf.mxu3 }
  0xec   :  { %v381_v22 = vadd.f32 %v380_v20, %v361_v16 }
  0xee   :  { %v387_v24 = vadd.f32 %v497_v18, %v381_v22 }
  0xf0   :  { %501 = vtanh.f32 %v387_v24 }
  0xf6   :  { %v502_v26 = vpop.eup %501 }
  0xf7   :  { %494 = vmatmul.msk.f32.vlgmr.msrb.gmra.mxu0 %vm401_vm0, %v502_v26 }
 0x174   :  { %v422_v38 = vpop.f32.mrf.mxu0 }
 0x175   :  { %v423_v40 = vadd.f32 %v498_v36, %v422_v38 }
 0x177   :  { %503 = vtanh.f32 %v423_v40 }
 0x17d   :  { %v504_v42 = vpop.eup %503 }
 0x17e   :  { %495 = vmatmul.msk.f32.vlgmr.msrb.gmra.mxu1 %vm434_vm1, %v504_v42 }
 0x1fb   :  { %v455_v48 = vpop.f32.mrf.mxu1 }
 0x1fc   :  { %v456_v50 = vadd.f32 %v499_v46, %v455_v48 }
 0x1fe   :  { %505 = vtanh.f32 %v456_v50 }
 0x204   :  { %v506_v52 = vpop.eup %505 }
 0x205   :  { %496 = vmatmul.msk.f32.vlgmr.msrb.gmra.mxu2 %vm464_vm2, %v506_v52 }
 0x288   :  { %v485_v54 = vpop.f32.mrf.mxu2 }
 0x289   :  { %v486_v58 = vadd.f32 %v500_v56, %v485_v54 }
 0x28b   :  { %489 = vst.msk [vmem:[%s1334_s10] sm:$0xff] %vm488_vm3, %v486_v58 }

</bundles_post_ra>
